<compile_context>
chip_gen: v7x
topology: tpu7x:2x2x1
jax: 0.10.0
libtpu: 0.0.40
codegen_flags: <defaults>
</compile_context>

<pallas_src>
import functools

import jax
import jax.numpy as jnp
from jax.experimental import pallas as pl
from jax.experimental.pallas import tpu as pltpu


def generator2_loss_kernel(x_ref, w1_ref, b1_ref, w2_ref, b2_ref,
                           idx_ref, reward_ref, loss_ref, *, inv_n_samples):
    # x_ref:      (Bc*N, F)        candidate features for this chunk (flattened)
    # w1_ref:     (F, F)           first Linear weight, pre-transposed (x @ w1)
    # b1_ref:     (1, F)
    # w2_ref:     (1, F)           second Linear weight as a row
    # b2_ref:     (1, 1)
    # idx_ref:    (Bc*S_pad, 1)    int32 chunk-local flat row indices (pad -> row b*N)
    # reward_ref: (Bc*S_pad, 1)    f32 rewards (padded rows are 0)
    # loss_ref:   (1, Bc)          f32 per-problem losses (lane-dense row)
    n_rows = x_ref.shape[0]          # Bc * N
    bs = idx_ref.shape[0]            # Bc * S_pad
    bc = loss_ref.shape[1]           # problems in this chunk
    s_pad = bs // bc

    # ---- Gather all sampled rows of the chunk with ONE one-hot MXU matmul ----
    # onehot: (Bc*S_pad, Bc*N), row r has a 1 at the chunk-local flat index.
    col_ids = jax.lax.broadcasted_iota(jnp.int32, (bs, n_rows), 1)
    onehot = (col_ids == idx_ref[...]).astype(jnp.float32)
    x_sel = jnp.dot(onehot, x_ref[...],
                    preferred_element_type=jnp.float32)              # (Bc*S_pad, F)

    # ---- ranker_dp on the sampled rows: Linear(F,F) -> tanh -> Linear(F,1) ----
    h = jnp.tanh(
        jnp.dot(x_sel, w1_ref[...], preferred_element_type=jnp.float32)
        + b1_ref[...])                                                # (Bc*S_pad, F)
    # Second linear as VPU multiply + lane reduction (avoids a 1-column MXU op).
    score = jnp.sum(h * w2_ref[...], axis=-1, keepdims=True) + b2_ref[...]  # (Bc*S_pad, 1)

    # log(sigmoid(score)) via the stable log-sigmoid identity (log1p form).
    log_prob = jnp.minimum(score, 0.0) - jnp.log1p(jnp.exp(-jnp.abs(score)))

    # Padded rows carry zero reward -> contribute nothing.
    weighted = log_prob * reward_ref[...]                             # (Bc*S_pad, 1)

    # ---- Per-problem reduction straight into a lane-dense (1, Bc) row ----
    # group one-hot: grp[r, b] = 1 iff row r belongs to problem b of the chunk.
    row_ids = jax.lax.broadcasted_iota(jnp.int32, (bs, bc), 0)
    prob_ids = jax.lax.broadcasted_iota(jnp.int32, (bs, bc), 1)
    grp = jnp.logical_and(row_ids >= prob_ids * s_pad,
                          row_ids < (prob_ids + 1) * s_pad).astype(jnp.float32)
    totals = jnp.sum(weighted * grp, axis=0, keepdims=True)           # (1, Bc)
    loss_ref[...] = -totals * inv_n_samples


def generator2_forward_batched(reward, pred_data, sample_index, params,
                               *, num_chunks=1):
    """Batched Generator2.forward: all problems fused into num_chunks grid steps.

    reward:       (B, S) or (B, S, 1) f32
    pred_data:    (B, N, F) f32
    sample_index: (B, S) int
    returns:      (B,) f32 losses
    """
    w1, b1, w2_row, b2 = params
    b_sz, n_cand, feat = pred_data.shape
    assert b_sz % num_chunks == 0, "num_chunks must divide the batch size"
    bc = b_sz // num_chunks                       # problems per chunk

    idx = sample_index.reshape(b_sz, -1).astype(jnp.int32)
    n_samples = idx.shape[1]
    rew = reward.reshape(b_sz, n_samples).astype(jnp.float32)

    s_pad = max(8, ((n_samples + 7) // 8) * 8)    # sublane-friendly padding
    pad = s_pad - n_samples
    if pad:
        idx = jnp.pad(idx, ((0, 0), (0, pad)))    # pad with index 0 (valid row)
        rew = jnp.pad(rew, ((0, 0), (0, pad)))    # pad with zero reward

    # Chunk-local flat row index: problem b of its chunk owns rows [b*N, (b+1)*N).
    local_b = (jnp.arange(b_sz, dtype=jnp.int32) % bc)[:, None]       # (B, 1)
    flat_idx = local_b * n_cand + idx                                 # (B, S_pad)

    # Reshape so each chunk is one leading-axis slice (single DMA per array/step).
    x3 = pred_data.astype(jnp.float32).reshape(num_chunks, bc * n_cand, feat)
    idx3 = flat_idx.reshape(num_chunks, bc * s_pad, 1)
    rew3 = rew.reshape(num_chunks, bc * s_pad, 1)

    kernel = functools.partial(generator2_loss_kernel,
                               inv_n_samples=1.0 / float(n_samples))

    const = lambda c: (0, 0)                      # weights: VMEM-resident block
    grid_spec = pltpu.PrefetchScalarGridSpec(
        num_scalar_prefetch=0,
        grid=(num_chunks,),
        in_specs=[
            pl.BlockSpec((None, bc * n_cand, feat), lambda c: (c, 0, 0)),  # pred_data
            pl.BlockSpec((feat, feat), const),                             # w1
            pl.BlockSpec((1, feat), const),                                # b1
            pl.BlockSpec((1, feat), const),                                # w2 (row)
            pl.BlockSpec((1, 1), const),                                   # b2
            pl.BlockSpec((None, bc * s_pad, 1), lambda c: (c, 0, 0)),      # flat idx
            pl.BlockSpec((None, bc * s_pad, 1), lambda c: (c, 0, 0)),      # reward
        ],
        out_specs=pl.BlockSpec((None, 1, bc), lambda c: (c, 0, 0)),        # (1, Bc) row
    )

    out = pl.pallas_call(
        kernel,
        out_shape=jax.ShapeDtypeStruct((num_chunks, 1, bc), jnp.float32),
        grid_spec=grid_spec,
        compiler_params=pltpu.CompilerParams(
            dimension_semantics=(
                ("parallel",) if num_chunks > 1 else ("arbitrary",))),
    )(x3, w1, b1, w2_row, b2, idx3, rew3)
    return out.reshape(b_sz)


def generator2_forward(reward, pred_data, sample_index, params):
    """Single-problem forward matching the PyTorch module signature."""
    losses = generator2_forward_batched(
        reward[None], pred_data[None], sample_index[None], params)
    return losses[0]


def init_params(key, feature_size):
    """nn.Linear-shaped params; w1 pre-transposed, w2 stored as a (1, F) row."""
    k1, k2, k3, k4 = jax.random.split(key, 4)
    bound = 1.0 / jnp.sqrt(feature_size)
    w1 = jax.random.uniform(k1, (feature_size, feature_size), jnp.float32,
                            -bound, bound)                 # x @ w1  <=>  x @ W1.T
    b1 = jax.random.uniform(k2, (1, feature_size), jnp.float32, -bound, bound)
    w2 = jax.random.uniform(k3, (1, feature_size), jnp.float32, -bound, bound)
    b2 = jax.random.uniform(k4, (1, 1), jnp.float32, -bound, bound)
    return w1, b1, w2, b2


def reference_forward(reward, pred_data, sample_index, params):
    """Pure-JAX reference mirroring the PyTorch forward."""
    w1, b1, w2_row, b2 = params
    h = jnp.tanh(pred_data @ w1 + b1)
    score = h @ w2_row.T + b2                                   # (N, 1)
    opt_prob = jax.nn.sigmoid(score)[sample_index.reshape(-1)]  # (S, 1)
    return -(jnp.log(opt_prob) * reward.reshape(-1, 1)).mean()


if __name__ == "__main__":
    feature_size = 32   # conf['feature_size']
    n_candidates = 8    # rows of pred_data per problem
    n_samples = 4       # len(sample_index)
    batch = 4           # independent problems fused into one kernel step

    key = jax.random.PRNGKey(0)
    kp, kx, ki, kr = jax.random.split(key, 4)

    params = init_params(kp, feature_size)
    pred_data = jax.random.normal(kx, (batch, n_candidates, feature_size),
                                  jnp.float32)
    sample_index = jax.random.randint(ki, (batch, n_samples), 0, n_candidates,
                                      jnp.int32)
    reward = jax.random.uniform(kr, (batch, n_samples, 1), jnp.float32, 0.1, 1.0)

    refs = jnp.stack([
        reference_forward(reward[b], pred_data[b], sample_index[b], params)
        for b in range(batch)])

    # Fully collapsed: one grid step handles the whole batch.
    losses = generator2_forward_batched(reward, pred_data, sample_index, params)
    losses = jax.block_until_ready(losses)
    assert jnp.allclose(losses, refs, rtol=2e-3, atol=2e-3), (losses, refs)

    # Chunked variant (e.g. 2 chunks -> one per TensorCore on v7x).
    losses2 = generator2_forward_batched(reward, pred_data, sample_index, params,
                                         num_chunks=2)
    losses2 = jax.block_until_ready(losses2)
    assert jnp.allclose(losses2, refs, rtol=2e-3, atol=2e-3), (losses2, refs)

    # Single-problem forward (the module's actual signature).
    loss0 = generator2_forward(reward[0], pred_data[0], sample_index[0], params)
    loss0 = jax.block_until_ready(loss0)
    assert jnp.allclose(loss0, refs[0], rtol=2e-3, atol=2e-3), (loss0, refs[0])

    print("KERNEL_OK")
</pallas_src>

<mosaic_0001>
module attributes {stable_mosaic.version = 11 : i64} {
  func.func @generator2_loss_kernel(%arg0: i32, %arg1: memref<1x32x32xf32, #tpu.memory_space<vmem>>, %arg2: memref<32x32xf32, #tpu.memory_space<vmem>>, %arg3: memref<1x32xf32, #tpu.memory_space<vmem>>, %arg4: memref<1x32xf32, #tpu.memory_space<vmem>>, %arg5: memref<1x1xf32, #tpu.memory_space<vmem>>, %arg6: memref<1x32x1xi32, #tpu.memory_space<vmem>>, %arg7: memref<1x32x1xf32, #tpu.memory_space<vmem>>, %arg8: memref<1x1x4xf32, #tpu.memory_space<vmem>>) attributes {dimension_semantics = [#tpu.dimension_semantics<arbitrary>], iteration_bounds = array<i64: 1>, scalar_prefetch = 0 : i64, scratch_operands = 0 : i64, tpu.core_type = #tpu.core_type<tc>, window_params = [{transform_indices = @transform_0, window_bounds = array<i64: 1, 32, 32>}, {pipeline_mode = #tpu.pipeline_mode<synchronous>, transform_indices = @transform_1, window_bounds = array<i64: 32, 32>}, {pipeline_mode = #tpu.pipeline_mode<synchronous>, transform_indices = @transform_2, window_bounds = array<i64: 1, 32>}, {pipeline_mode = #tpu.pipeline_mode<synchronous>, transform_indices = @transform_3, window_bounds = array<i64: 1, 32>}, {pipeline_mode = #tpu.pipeline_mode<synchronous>, transform_indices = @transform_4, window_bounds = array<i64: 1, 1>}, {transform_indices = @transform_5, window_bounds = array<i64: 1, 32, 1>}, {transform_indices = @transform_6, window_bounds = array<i64: 1, 32, 1>}, {transform_indices = @transform_7, window_bounds = array<i64: 1, 1, 4>}]} {
    %0 = tpu.iota {dimensions = array<i32: 1>} : vector<32x32xi32>
    %c0 = arith.constant 0 : index
    %c0_0 = arith.constant 0 : index
    %c0_1 = arith.constant 0 : index
    %1 = vector.load %arg6[%c0, %c0_0, %c0_1] : memref<1x32x1xi32, #tpu.memory_space<vmem>>, vector<1x32x1xi32>
    %2 = vector.shape_cast %1 : vector<1x32x1xi32> to vector<32x1xi32>
    %3 = vector.broadcast %2 : vector<32x1xi32> to vector<32x32xi32>
    %4 = arith.cmpi eq, %0, %3 : vector<32x32xi32>
    %5 = arith.extui %4 : vector<32x32xi1> to vector<32x32xi32>
    %6 = arith.sitofp %5 : vector<32x32xi32> to vector<32x32xf32>
    %c0_2 = arith.constant 0 : index
    %c0_3 = arith.constant 0 : index
    %c0_4 = arith.constant 0 : index
    %7 = vector.load %arg1[%c0_2, %c0_3, %c0_4] : memref<1x32x32xf32, #tpu.memory_space<vmem>>, vector<1x32x32xf32>
    %8 = vector.shape_cast %7 : vector<1x32x32xf32> to vector<32x32xf32>
    %cst = arith.constant dense<0.000000e+00> : vector<32x32xf32>
    %9 = tpu.matmul %6, %8, %cst {dimension_numbers = #tpu.dot_dimension_numbers<[1], [0], [0], [1], [0, 0, 1, 1], [], []>} : vector<32x32xf32>, vector<32x32xf32>, vector<32x32xf32> -> vector<32x32xf32>
    %c0_5 = arith.constant 0 : index
    %c0_6 = arith.constant 0 : index
    %10 = vector.load %arg2[%c0_5, %c0_6] : memref<32x32xf32, #tpu.memory_space<vmem>>, vector<32x32xf32>
    %cst_7 = arith.constant dense<0.000000e+00> : vector<32x32xf32>
    %11 = tpu.matmul %9, %10, %cst_7 {dimension_numbers = #tpu.dot_dimension_numbers<[1], [0], [0], [1], [0, 0, 1, 1], [], []>} : vector<32x32xf32>, vector<32x32xf32>, vector<32x32xf32> -> vector<32x32xf32>
    %c0_8 = arith.constant 0 : index
    %c0_9 = arith.constant 0 : index
    %12 = vector.load %arg3[%c0_8, %c0_9] : memref<1x32xf32, #tpu.memory_space<vmem>>, vector<1x32xf32>
    %13 = vector.broadcast %12 : vector<1x32xf32> to vector<32x32xf32>
    %14 = arith.addf %11, %13 : vector<32x32xf32>
    %15 = math.tanh %14 : vector<32x32xf32>
    %c0_10 = arith.constant 0 : index
    %c0_11 = arith.constant 0 : index
    %16 = vector.load %arg4[%c0_10, %c0_11] : memref<1x32xf32, #tpu.memory_space<vmem>>, vector<1x32xf32>
    %17 = vector.broadcast %16 : vector<1x32xf32> to vector<32x32xf32>
    %18 = arith.mulf %15, %17 : vector<32x32xf32>
    %cst_12 = arith.constant dense<0.000000e+00> : vector<32xf32>
    %19 = vector.multi_reduction <add>, %18, %cst_12 [1] : vector<32x32xf32> to vector<32xf32>
    %20 = vector.shape_cast %19 : vector<32xf32> to vector<32x1xf32>
    %c0_13 = arith.constant 0 : index
    %c0_14 = arith.constant 0 : index
    %21 = vector.load %arg5[%c0_13, %c0_14] : memref<1x1xf32, #tpu.memory_space<vmem>>, vector<1x1xf32>
    %22 = vector.broadcast %21 : vector<1x1xf32> to vector<32x1xf32>
    %23 = arith.addf %20, %22 : vector<32x1xf32>
    %cst_15 = arith.constant 0.000000e+00 : f32
    %24 = vector.broadcast %cst_15 : f32 to vector<32x1xf32>
    %25 = arith.minimumf %23, %24 : vector<32x1xf32>
    %26 = math.absf %23 : vector<32x1xf32>
    %cst_16 = arith.constant 0.000000e+00 : f32
    %27 = vector.broadcast %cst_16 : f32 to vector<32x1xf32>
    %28 = arith.subf %27, %26 : vector<32x1xf32>
    %29 = math.exp %28 : vector<32x1xf32>
    %30 = math.log1p %29 : vector<32x1xf32>
    %31 = arith.subf %25, %30 : vector<32x1xf32>
    %c0_17 = arith.constant 0 : index
    %c0_18 = arith.constant 0 : index
    %c0_19 = arith.constant 0 : index
    %32 = vector.load %arg7[%c0_17, %c0_18, %c0_19] : memref<1x32x1xf32, #tpu.memory_space<vmem>>, vector<1x32x1xf32>
    %33 = vector.shape_cast %32 : vector<1x32x1xf32> to vector<32x1xf32>
    %34 = arith.mulf %31, %33 : vector<32x1xf32>
    %35 = tpu.iota {dimensions = array<i32: 0>} : vector<32x4xi32>
    %36 = tpu.iota {dimensions = array<i32: 1>} : vector<32x4xi32>
    %c8_i32 = arith.constant 8 : i32
    %37 = vector.broadcast %c8_i32 : i32 to vector<32x4xi32>
    %38 = arith.muli %36, %37 : vector<32x4xi32>
    %39 = arith.cmpi sge, %35, %38 : vector<32x4xi32>
    %c1_i32 = arith.constant 1 : i32
    %40 = vector.broadcast %c1_i32 : i32 to vector<32x4xi32>
    %41 = arith.addi %36, %40 : vector<32x4xi32>
    %c8_i32_20 = arith.constant 8 : i32
    %42 = vector.broadcast %c8_i32_20 : i32 to vector<32x4xi32>
    %43 = arith.muli %41, %42 : vector<32x4xi32>
    %44 = arith.cmpi slt, %35, %43 : vector<32x4xi32>
    %45 = arith.andi %39, %44 : vector<32x4xi1>
    %46 = arith.extui %45 : vector<32x4xi1> to vector<32x4xi32>
    %47 = arith.sitofp %46 : vector<32x4xi32> to vector<32x4xf32>
    %48 = vector.broadcast %34 : vector<32x1xf32> to vector<32x4xf32>
    %49 = arith.mulf %48, %47 : vector<32x4xf32>
    %cst_21 = arith.constant dense<0.000000e+00> : vector<4xf32>
    %50 = vector.multi_reduction <add>, %49, %cst_21 [0] : vector<32x4xf32> to vector<4xf32>
    %51 = vector.shape_cast %50 : vector<4xf32> to vector<1x4xf32>
    %cst_22 = arith.constant 0.000000e+00 : f32
    %52 = vector.broadcast %cst_22 : f32 to vector<1x4xf32>
    %53 = arith.subf %52, %51 : vector<1x4xf32>
    %cst_23 = arith.constant 2.500000e-01 : f32
    %54 = vector.broadcast %cst_23 : f32 to vector<1x4xf32>
    %55 = arith.mulf %53, %54 : vector<1x4xf32>
    %c0_24 = arith.constant 0 : index
    %c0_25 = arith.constant 0 : index
    %c0_26 = arith.constant 0 : index
    %56 = vector.load %arg8[%c0_24, %c0_25, %c0_26] : memref<1x1x4xf32, #tpu.memory_space<vmem>>, vector<1x1x4xf32>
    %57 = vector.shape_cast %56 : vector<1x1x4xf32> to vector<1x4xf32>
    %58 = vector.shape_cast %55 : vector<1x4xf32> to vector<1x1x4xf32>
    tpu.vector_store %arg8[%c0_24, %c0_25, %c0_26], %58 {strides = array<i32>} : memref<1x1x4xf32, #tpu.memory_space<vmem>>, vector<1x1x4xf32>,
    return
  }
  func.func @transform_0(%arg0: i32) -> (i32, i32, i32) {
    %c0_i32 = arith.constant 0 : i32
    %c0_i32_0 = arith.constant 0 : i32
    %c0_i32_1 = arith.constant 0 : i32
    return %arg0, %c0_i32, %c0_i32_0 : i32, i32, i32
  }
  func.func @transform_1(%arg0: i32) -> (i32, i32) {
    %c0_i32 = arith.constant 0 : i32
    %c0_i32_0 = arith.constant 0 : i32
    %c0_i32_1 = arith.constant 0 : i32
    return %c0_i32, %c0_i32_0 : i32, i32
  }
  func.func @transform_2(%arg0: i32) -> (i32, i32) {
    %c0_i32 = arith.constant 0 : i32
    %c0_i32_0 = arith.constant 0 : i32
    %c0_i32_1 = arith.constant 0 : i32
    return %c0_i32, %c0_i32_0 : i32, i32
  }
  func.func @transform_3(%arg0: i32) -> (i32, i32) {
    %c0_i32 = arith.constant 0 : i32
    %c0_i32_0 = arith.constant 0 : i32
    %c0_i32_1 = arith.constant 0 : i32
    return %c0_i32, %c0_i32_0 : i32, i32
  }
  func.func @transform_4(%arg0: i32) -> (i32, i32) {
    %c0_i32 = arith.constant 0 : i32
    %c0_i32_0 = arith.constant 0 : i32
    %c0_i32_1 = arith.constant 0 : i32
    return %c0_i32, %c0_i32_0 : i32, i32
  }
  func.func @transform_5(%arg0: i32) -> (i32, i32, i32) {
    %c0_i32 = arith.constant 0 : i32
    %c0_i32_0 = arith.constant 0 : i32
    %c0_i32_1 = arith.constant 0 : i32
    return %arg0, %c0_i32, %c0_i32_0 : i32, i32, i32
  }
  func.func @transform_6(%arg0: i32) -> (i32, i32, i32) {
    %c0_i32 = arith.constant 0 : i32
    %c0_i32_0 = arith.constant 0 : i32
    %c0_i32_1 = arith.constant 0 : i32
    return %arg0, %c0_i32, %c0_i32_0 : i32, i32, i32
  }
  func.func @transform_7(%arg0: i32) -> (i32, i32, i32) {
    %c0_i32 = arith.constant 0 : i32
    %c0_i32_0 = arith.constant 0 : i32
    %c0_i32_1 = arith.constant 0 : i32
    return %arg0, %c0_i32, %c0_i32_0 : i32, i32, i32
  }
}

</mosaic_0001>

<bundles_post_ra>
// kernel: tpu_custom_call.1
= control target key start
LH: loop header
LB: loop body
LE: loop exit
PB: predicated region body
PF: predicated region fallthrough
CT: control target
= control target key end

     0   :  { %s741_s0 = inlined_call_operand.vmem [shape: f32[1,32,32], index: 0, kind: input, shape index: {}]   ;;  %s742_s1 = inlined_call_operand.vmem [shape: f32[32,32], index: 1, kind: input, shape index: {}]   ;;  %s743_s2 = inlined_call_operand.vmem [shape: f32[1,32], index: 2, kind: input, shape index: {}]   ;;  %s744_s3 = inlined_call_operand.vmem [shape: f32[1,32], index: 3, kind: input, shape index: {}]   ;;  %s745_s4 = inlined_call_operand.<no memory space> [shape: f32[1,1], index: 4, kind: input, shape index: {}]   ;;  %s746_s5 = inlined_call_operand.vmem [shape: s32[1,32,1], index: 5, kind: input, shape index: {}]   ;;  %s747_s6 = inlined_call_operand.vmem [shape: f32[1,32,1], index: 6, kind: input, shape index: {}]   ;;  %s748_s7 = inlined_call_operand.hbm [shape: f32[1,1,4], index: 7, kind: output, shape index: {}]  }
   0x1   :  { %v12_v0 = vstv %s745_s4 }
   0x2   :  { %13 = vst [vmem:[#allocation2] sm:$0x1] %v12_v0 }
   0x3   :  { %v33_v1 = vld [vmem:[%s746_s5 + $0x10] sm:$0xff]  ;;  %v31_v2 = vld [vmem:[%s746_s5] sm:$0xff]  ;;  %v591_v3 = vmov 0   ;;  %v60_v5 = vld [vmem:[%s741_s0 + $0x8] sm:$0xff] }
   0x4   :  { %542 = vset.pattern.permute.xlu1 %v591_v3  ;;  %541 = vset.pattern.permute.xlu0 %v591_v3  ;;  %v59_v4 = vld [vmem:[%s741_s0] sm:$0xff]  ;;  %v61_v7 = vld [vmem:[%s741_s0 + $0x10] sm:$0xff]  ;;  %v62_v8 = vld [vmem:[%s741_s0 + $0x18] sm:$0xff] }
   0x5   :  { %42 = vperm.xlu1 %542, %v33_v1   ;;  %36 = vperm.xlu0 %541, %v31_v2   ;;  %v522_v6 = vpack.c.bf16 %v60_v5, %v59_v4 }
   0x6   :  { %14 = vsyncpa [#allocation4], 0  ;;  %v34_v9 = vld [vmem:[%s746_s5 + $0x18] sm:$0xff]  ;;  %v32_v10 = vld [vmem:[%s746_s5 + $0x8] sm:$0xff]  ;;  %v526_v11 = vpack.c.bf16 %v62_v8, %v61_v7  ;;  %v29_v18 = vlaneseq  ;;  %vm63_vm0 = vcmask 261120   ;;  %v592_v22 = vmov 0.0  }
   0x7   :  { %523 = vmatprep.subr.bf16.mxu0 %v522_v6  ;;  %v161_v12 = vld [vmem:[%s742_s1] sm:$0xff]  ;;  %v162_v13 = vld [vmem:[%s742_s1 + $0x8] sm:$0xff]  ;;  %v163_v14 = vld [vmem:[%s742_s1 + $0x10] sm:$0xff] }
   0x8   :  { %525 = vmatpush3.bf16.msra.mxu0 %v522_v6  ;;  %v530_v15 = vpack.c.bf16 %v162_v13, %v161_v12  ;;  %v164_v16 = vld [vmem:[%s742_s1 + $0x18] sm:$0xff]  ;;  %v674_v19 = vand.u32 127, %v29_v18  ;;  %v467_v33 = vld [vmem:[%s743_s2] ss:$0 sm:$0xff] }
   0x9   :  { %45 = vperm.xlu1 %542, %v34_v9   ;;  %39 = vperm.xlu0 %541, %v32_v10   ;;  %v534_v17 = vpack.c.bf16 %v164_v16, %v163_v14  ;;  %v472_v42 = vld [vmem:[%s744_s3] ss:$0 sm:$0xff] }
   0xa   :  { %527 = vmatprep.subr.bf16.mxu0 %v526_v11  ;;  %531 = vmatprep.subr.bf16.mxu1 %v530_v15  ;;  %v473_v55 = vld [vmem:[#allocation2] ss:$0 sm:$0xff] }
   0xb   :  { %533 = vmatpush3.bf16.msra.mxu1 %v530_v15 }
   0xc   :  { %529 = vmatpush3.bf16.msra.mxu0 %v526_v11  ;;  %535 = vmatprep.subr.bf16.mxu1 %v534_v17 }
   0xf   :  { %537 = vmatpush3.bf16.msra.mxu1 %v534_v17 }
  0x84   :  { %v43_v20 = vpop.permute.xlu1 %42  ;;  %v37_v21 = vpop.permute.xlu0 %36 }
  0x85   :  { %vm47_vm1 = vcmp.eq.s32.totalorder %v674_v19, %v37_v21  ;;  %vm49_vm2 = vcmp.eq.s32.totalorder %v674_v19, %v43_v20 }
  0x86   :  { %v459_v23 = vsel %vm47_vm1, 1.0, %v592_v22  ;;  %v461_v26 = vsel %vm49_vm2, 1.0, %v592_v22 }
  0x87   :  { %502 = vmatprep.mubr.msk.f32.mxu0 %vm63_vm0, %v459_v23 }
  0x88   :  { %v46_v24 = vpop.permute.xlu1 %45  ;;  %v40_v25 = vpop.permute.xlu0 %39 }
  0x89   :  { %vm48_vm3 = vcmp.eq.s32.totalorder %v674_v19, %v40_v25  ;;  %vm50_vm4 = vcmp.eq.s32.totalorder %v674_v19, %v46_v24 }
  0x8a   :  { %v460_v27 = vsel %vm48_vm3, 1.0, %v592_v22  ;;  %v462_v28 = vsel %vm50_vm4, 1.0, %v592_v22  ;;  %vm427_vm4 = vcmask 31744  }
  0x8b   :  { %503 = vmatmul.mubr.msk.f32.vlgmr.msra.gmra.mrb[0].mxu0 %vm63_vm0, %v460_v27 }
  0x8c   :  { %505 = vmatprep.mubr.msk.f32.mxu0 %vm63_vm0, %v461_v26 }
  0x8f   :  { %506 = vmatmul.mubr.msk.f32.gmra.mrb[2].mxu0 %vm63_vm0, %v462_v28 }
 0x15e   :  { %v504_v29 = vpop.f32.mrb[0].mxu0 }
 0x15f   :  { %v142_v30 = vpop.f32.mrb[1].mxu0 }
 0x160   :  { %516 = vmatprep.mubr.msk.f32.mxu1 %vm63_vm0, %v142_v30 }
 0x161   :  { %517 = vmatmul.mubr.msk.f32.vlgmr.msra.gmra.mrb[0].mxu1 %vm63_vm0, %v504_v29 }
 0x162   :  { %v507_v31 = vpop.f32.mrb[2].mxu0 }
 0x163   :  { %v152_v32 = vpop.f32.mrb[3].mxu0 }
 0x164   :  { %519 = vmatprep.mubr.msk.f32.mxu1 %vm63_vm0, %v152_v32 }
 0x165   :  { %520 = vmatmul.mubr.msk.f32.gmra.mrb[2].mxu1 %vm63_vm0, %v507_v31 }
 0x234   :  { %v518_v34 = vpop.f32.mrb[0].mxu1 }
 0x235   :  { %v256_v35 = vadd.f32 %v518_v34, %v467_v33  ;;  %v250_v36 = vpop.f32.mrb[1].mxu1 }
 0x236   :  { %v251_v37 = vadd.f32 %v467_v33, %v250_v36 }
 0x237   :  { %543 = vtanh.f32 %v256_v35 }
 0x238   :  { %545 = vtanh.f32 %v251_v37  ;;  %v521_v38 = vpop.f32.mrb[2].mxu1 }
 0x239   :  { %v266_v39 = vadd.f32 %v521_v38, %v467_v33  ;;  %v260_v40 = vpop.f32.mrb[3].mxu1 }
 0x23a   :  { %v261_v41 = vadd.f32 %v467_v33, %v260_v40 }
 0x23b   :  { %547 = vtanh.f32 %v266_v39 }
 0x23c   :  { %549 = vtanh.f32 %v261_v41 }
 0x241   :  { %v544_v43 = vpop.eup %543 }
 0x242   :  { %v546_v44 = vpop.eup %545  ;;  %v281_v45 = vmul.f32 %v544_v43, %v472_v42 }
 0x243   :  { %v280_v46 = vmul.f32 %v546_v44, %v472_v42 }
 0x244   :  { %v287_v47 = vsel %vm63_vm0, %v281_v45, 0.0  ;;  %v367_v45 = vld [vmem:[%s747_s6] sm:$0xff] }
 0x245   :  { %v548_v48 = vpop.eup %547  ;;  %288 = vadd.xlane.f32.xlu1 %v287_v47  ;;  %v284_v49 = vsel %vm63_vm0, %v280_v46, 0.0 }
 0x246   :  { %v550_v50 = vpop.eup %549  ;;  %285 = vadd.xlane.f32.xlu0 %v284_v49  ;;  %v283_v53 = vmul.f32 %v548_v48, %v472_v42 }
 0x247   :  { %v282_v51 = vmul.f32 %v550_v50, %v472_v42  ;;  %v368_v42 = vld [vmem:[%s747_s6 + $0x8] sm:$0xff] }
 0x248   :  { %v293_v54 = vsel %vm63_vm0, %v283_v53, 0.0 }
 0x249   :  { %v290_v52 = vsel %vm63_vm0, %v282_v51, 0.0 }
 0x24a   :  { %291 = vadd.xlane.f32.xlu0 %v290_v52 }
 0x24e   :  { %294 = vadd.xlane.f32.xlu0 %v293_v54 }
 0x2d2   :  { %v289_v56 = vpop.xlane.xlu1 %288 }
 0x2d3   :  { %v304_v57 = vadd.f32 %v473_v55, %v289_v56  ;;  %v286_v58 = vpop.xlane.xlu0 %285  ;;  %v369_v56 = vld [vmem:[%s747_s6 + $0x10] sm:$0xff] }
 0x2d4   :  { %v303_v59 = vadd.f32 %v473_v55, %v286_v58 }
 0x2d5   :  { %v312_v60 = vand.u32 2147483647, %v304_v57  ;;  %v308_v32 = vmin.f32 %v304_v57, 0.0 }
 0x2d6   :  { %v311_v61 = vand.u32 2147483647, %v303_v59  ;;  %v307_v40 = vmin.f32 %v303_v59, 0.0 }
 0x2d7   :  { %v316_v62 = vsub.f32 0.0, %v312_v60  ;;  %v292_v63 = vpop.xlane.xlu0 %291 }
 0x2d8   :  { %v315_v0 = vsub.f32 0.0, %v311_v61  ;;  %v702_v1 = vadd.f32 %v473_v55, %v292_v63 }
 0x2d9   :  { %v321_v2 = vmul.f32 1.442695, %v316_v62 }
 0x2da   :  { %v319_v3 = vmul.f32 1.442695, %v315_v0  ;;  %v313_v4 = vand.u32 2147483647, %v702_v1  ;;  %v309_v52 = vmin.f32 %v702_v1, 0.0  ;;  %v370_v0 = vld [vmem:[%s747_s6 + $0x18] sm:$0xff] }
 0x2db   :  { %551 = vpow2.f32 %v321_v2  ;;  %v295_v5 = vpop.xlane.xlu0 %294  ;;  %s593_s6 = smov [#allocation3]  }
 0x2dc   :  { %553 = vpow2.f32 %v319_v3  ;;  %v317_v6 = vsub.f32 0.0, %v313_v4  ;;  %v705_v7 = vadd.f32 %v473_v55, %v295_v5  ;;  %v376_v3 = vshrl.u32 %v29_v18, 7  ;;  %s451_s10 = sshll.u32 %s593_s6, 4  ;;  %s452_s10 = int_to_ptr.vmem [resolvable:$true] %s451_s10 }
 0x2dd   :  { %v385_v4 = vadd.s32 1, %v674_v19  ;;  %s567_s4 = scalar_lea.vmem %s452_s10, 16  ;;  %s571_s11 = scalar_lea.vmem %s452_s10, 32 }
 0x2de   :  { %v323_v8 = vmul.f32 1.442695, %v317_v6  ;;  %v314_v9 = vand.u32 2147483647, %v705_v7  ;;  %v310_v61 = vmin.f32 %v705_v7, 0.0  ;;  %v377_v5 = vadd.s32 8, %v376_v3  ;;  %p568_p0 = scmp.ne.s32.totalorder %s452_s10, %s567_s4  ;;  %p572_p1 = scmp.lt.s32.totalorder %s452_s10, %s452_s10 }
 0x2df   :  { %v380_v6 = vmul.u32 8, %v674_v19  ;;  %v378_v7 = vadd.s32 16, %v376_v3  ;;  %p573_p2 = scmp.lt.s32.totalorder %s571_s11, %s567_s4 }
 0x2e0   :  { %555 = vpow2.f32 %v323_v8  ;;  %v318_v10 = vsub.f32 0.0, %v314_v9  ;;  %v386_v8 = vmul.u32 8, %v385_v4  ;;  %v379_v9 = vadd.s32 24, %v376_v3 }
 0x2e1   :  { %vm382_vm9 = vcmp.ge.s32.totalorder %v377_v5, %v380_v6  ;;  %vm381_vm11 = vcmp.ge.s32.totalorder %v376_v3, %v380_v6  ;;  %vm383_vm15 = vcmp.ge.s32.totalorder %v378_v7, %v380_v6  ;;  %p574_p3 = por %p573_p2, %p572_p1 }
 0x2e2   :  { %v325_v11 = vmul.f32 1.442695, %v318_v10  ;;  %vm388_vm10 = vcmp.lt.s32.totalorder %v377_v5, %v386_v8  ;;  %vm387_vm12 = vcmp.lt.s32.totalorder %v376_v3, %v386_v8  ;;  %vm389_vm0 = vcmp.lt.s32.totalorder %v378_v7, %v386_v8 }
 0x2e3   :  { %vm392_vm13 = vmand %vm382_vm9, %vm388_vm10  ;;  %vm384_vm2 = vcmp.ge.s32.totalorder %v379_v9, %v380_v6  ;;  %vm390_vm3 = vcmp.lt.s32.totalorder %v379_v9, %v386_v8  ;;  %p575_p4 = pnand %p574_p3, %p568_p0 }
 0x2e4   :  { %557 = vpow2.f32 %v325_v11  ;;  %vm391_vm14 = vmand %vm381_vm11, %vm387_vm12  ;;  %v475_v10 = vsel %vm392_vm13, 1.0, %v592_v22 }
 0x2e5   :  { %v552_v12 = vpop.eup %551  ;;  %v474_v18 = vsel %vm391_vm14, 1.0, %v592_v22  ;;  %vm393_vm1 = vmand %vm383_vm15, %vm389_vm0 }
 0x2e6   :  { %v554_v13 = vpop.eup %553  ;;  %v336_v14 = vadd.f32 1.0, %v552_v12  ;;  %v339_v17 = vmul.f32 -0.5, %v552_v12  ;;  %v342_v25 = vand.u32 2147483647, %v552_v12 }
 0x2e7   :  { %v327_v15 = vadd.f32 1.0, %v554_v13  ;;  %v330_v21 = vmul.f32 -0.5, %v554_v13  ;;  %v333_v29 = vand.u32 2147483647, %v554_v13 }
 0x2e8   :  { %559 = vlog2.f32 %v336_v14  ;;  %v340_v24 = vadd.f32 1.0, %v339_v17  ;;  %vm343_vm5 = vcmp.lt.f32.partialorder %v342_v25, 0.0004427343  ;;  %v476_v14 = vsel %vm393_vm1, 1.0, %v592_v22 }
 0x2e9   :  { %561 = vlog2.f32 %v327_v15  ;;  %v331_v27 = vadd.f32 1.0, %v330_v21  ;;  %vm334_vm6 = vcmp.lt.f32.partialorder %v333_v29, 0.0004427343 }
 0x2ea   :  { %v556_v16 = vpop.eup %555  ;;  %v341_v34 = vmul.f32 %v552_v12, %v340_v24 }
 0x2eb   :  { %v345_v20 = vadd.f32 1.0, %v556_v16  ;;  %v348_v28 = vmul.f32 -0.5, %v556_v16  ;;  %v332_v36 = vmul.f32 %v554_v13, %v331_v27  ;;  %v351_v41 = vand.u32 2147483647, %v556_v16 }
 0x2ed   :  { %563 = vlog2.f32 %v345_v20  ;;  %v349_v37 = vadd.f32 1.0, %v348_v28  ;;  %vm352_vm7 = vcmp.lt.f32.partialorder %v351_v41, 0.0004427343 }
 0x2ee   :  { %v558_v23 = vpop.eup %557 }
 0x2ef   :  { %v354_v26 = vadd.f32 1.0, %v558_v23  ;;  %v357_v38 = vmul.f32 -0.5, %v558_v23  ;;  %v350_v49 = vmul.f32 %v556_v16, %v349_v37  ;;  %v360_v53 = vand.u32 2147483647, %v558_v23 }
 0x2f1   :  { %565 = vlog2.f32 %v354_v26  ;;  %v358_v50 = vadd.f32 1.0, %v357_v38  ;;  %vm361_vm8 = vcmp.lt.f32.partialorder %v360_v53, 0.0004427343 }
 0x2f2   :  { %v560_v30 = vpop.eup %559 }
 0x2f3   :  { %v562_v31 = vpop.eup %561  ;;  %v338_v33 = vmul.f32 0.6931472, %v560_v30  ;;  %v359_v60 = vmul.f32 %v558_v23, %v358_v50 }
 0x2f4   :  { %v329_v35 = vmul.f32 0.6931472, %v562_v31 }
 0x2f5   :  { %v344_v39 = vsel %vm343_vm5, %v341_v34, %v338_v33  ;;  %vm394_vm5 = vmand %vm384_vm2, %vm390_vm3 }
 0x2f6   :  { %v364_v43 = vsub.f32 %v308_v32, %v344_v39  ;;  %v335_v44 = vsel %vm334_vm6, %v332_v36, %v329_v35  ;;  %v477_v21 = vsel %vm394_vm5, 1.0, %v592_v22  ;;  %vm443_vm6 = vcmask 24576  }
 0x2f7   :  { %v564_v46 = vpop.eup %563  ;;  %v363_v47 = vsub.f32 %v307_v40, %v335_v44 }
 0x2f8   :  { %v347_v48 = vmul.f32 0.6931472, %v564_v46  ;;  %v372_v51 = vmul.f32 %v368_v42, %v364_v43 }
 0x2f9   :  { %v371_v54 = vmul.f32 %v367_v45, %v363_v47 }
 0x2fa   :  { %v353_v55 = vsel %vm352_vm7, %v350_v49, %v347_v48  ;;  %410 = vperm.xlu0 %541, %v372_v51  }
 0x2fb   :  { %v566_v57 = vpop.eup %565  ;;  %v365_v58 = vsub.f32 %v309_v52, %v353_v55  ;;  %405 = vperm.xlu1 %542, %v371_v54  }
 0x2fc   :  { %v356_v59 = vmul.f32 0.6931472, %v566_v57 }
 0x2fd   :  { %v373_v62 = vmul.f32 %v369_v56, %v365_v58 }
 0x2fe   :  { %v362_v63 = vsel %vm361_vm8, %v359_v60, %v356_v59 }
 0x2ff   :  { %v366_v1 = vsub.f32 %v310_v61, %v362_v63  ;;  %415 = vperm.xlu1 %542, %v373_v62  }
 0x301   :  { %v374_v2 = vmul.f32 %v370_v0, %v366_v1 }
 0x303   :  { %420 = vperm.xlu1 %542, %v374_v2  }
 0x379   :  { %v411_v11 = vpop.permute.xlu0 %410 }
 0x37a   :  { %v406_v12 = vpop.permute.xlu1 %405  ;;  %v424_v19 = vmul.f32 %v475_v10, %v411_v11 }
 0x37b   :  { %v423_v13 = vmul.f32 %v474_v18, %v406_v12 }
 0x37c   :  { %v429_v16 = vsel %vm427_vm4, %v424_v19, 0.0 }
 0x37d   :  { %v428_v17 = vsel %vm427_vm4, %v423_v13, 0.0 }
 0x37e   :  { %v416_v15 = vpop.permute.xlu1 %415  ;;  %v430_v24 = vadd.f32 %v429_v16, %v428_v17 }
 0x37f   :  { %v425_v20 = vmul.f32 %v476_v14, %v416_v15 }
 0x381   :  { %v431_v23 = vsel %vm427_vm4, %v425_v20, 0.0 }
 0x382   :  { %v421_v25 = vpop.permute.xlu1 %420  ;;  %v432_v27 = vadd.f32 %v431_v23, %v430_v24 }
 0x383   :  { %v426_v26 = vmul.f32 %v477_v21, %v421_v25 }
 0x385   :  { %v433_v28 = vsel %vm427_vm4, %v426_v26, 0.0 }
 0x386   :  { %v434_v29 = vadd.f32 %v433_v28, %v432_v27 }
 0x388   :  { %v435_v30 = vrot.slane %v434_v29, 4 }
 0x38a   :  { %v436_v31 = vadd.f32 %v435_v30, %v434_v29 }
 0x38c   :  { %v437_v32 = vrot.slane %v436_v31, 2 }
 0x38e   :  { %v438_v33 = vadd.f32 %v437_v32, %v436_v31 }
 0x390   :  { %v439_v34 = vrot.slane %v438_v33, 1 }
 0x392   :  { %v440_v35 = vadd.f32 %v439_v34, %v438_v33 }
 0x394   :  { %v441_v36 = vsub.f32 0.0, %v440_v35 }
 0x396   :  { %v442_v37 = vmul.f32 0.25, %v441_v36 }
 0x398   :  { %444 = vst.msk [vmem:[#allocation3] sm:$0x1] %vm443_vm6, %v442_v37 }
 0x399   :  { %578 = shalt.err (!%p575_p4)
}
 0x39a   :  { %s579_s14 = scalar_lea.hbm %s748_s7, 16 }
 0x39b   :  { %p580_p5 = scmp.ne.s32.totalorder %s748_s7, %s579_s14  ;;  %p583_p6 = scmp.lt.u32.totalorder %s579_s14, %s748_s7 }
 0x39d   :  { %p585_p7 = pnand %p583_p6, %p580_p5 }
 0x39f   :  { %588 = shalt.err (!%p585_p7)
}
 0x3a0   :  { %454 = dma.vmem_to_hbm [thread:$0]  %s452_s10, 16, %s748_s7, [#allocation4]  }
 0x3a1   :  { %589 = dma.done.wait [#allocation4], 16  }
 0x3a2   :  { %590 = vsyncadd [#allocation4], 4294967280 }
 0x3a3   :  { %458 = vsyncpa [#allocation4], 1 }

</bundles_post_ra>
